<compile_context>
chip_gen: v6e
topology: v6e:2x2x1
jax: 0.10.0
libtpu: 0.0.40
codegen_flags: <defaults>
</compile_context>

<pallas_src>
import jax
import jax.numpy as jnp
from jax.experimental import pallas as pl
from jax.experimental.pallas import tpu as pltpu


def _make_conv_relu_kernel(KH, H_out, WoC):
    def kernel(x_ref, a_ref, o_ref):
        # x_ref: (Hp, W*Cin)        bf16  one row-padded image (W-halo is in A)
        # a_ref: (W*Cin, KH*WoC)    bf16  conv lowered to a single row matmul
        # o_ref: (H_out, WoC)       f32   lane-dense output (WoC % 128 == 0 here)
        y = jnp.dot(x_ref[...], a_ref[...],
                    preferred_element_type=jnp.float32)      # (Hp, KH*WoC) f32
        # Combine the KH taps: out[h] = sum_kh y[h+kh, kh*WoC:(kh+1)*WoC].
        # Lane offsets are multiples of 128 (vreg aligned); sublane offsets 0..KH-1
        # on an unpacked f32 value are cheap relayouts.
        acc = y[0:H_out, 0:WoC]
        for kh in range(1, KH):
            acc = acc + y[kh:kh + H_out, kh * WoC:(kh + 1) * WoC]
        o_ref[...] = jnp.maximum(acc, 0.0).astype(o_ref.dtype)   # ReLU
    return kernel


def _conv_as_row_matmul_weights(weight, W_in, padding):
    """Build A_cat (W_in*Cin, KH*W_out*Cout):  for a row of the (row-padded) input
    laid out as length-W_in*Cin vector, `row @ A_cat` produces, for every tap kh,
    that row's contribution to the W_out*Cout lane-dense output row.  Out-of-range
    W taps simply have no entry, so no W padding of the input is needed."""
    Cout, Cin, KH, KW = weight.shape
    W_out = W_in + 2 * padding - KW + 1
    w_t = jnp.transpose(weight, (2, 3, 1, 0))          # (KH, KW, Cin, Cout)
    wi = jnp.arange(W_in)[:, None]                      # input column
    wo = jnp.arange(W_out)[None, :]                     # output column
    kw_map = wi - wo + padding                          # tap index, (W_in, W_out)
    valid = (kw_map >= 0) & (kw_map < KW)
    kw_c = jnp.clip(kw_map, 0, KW - 1)
    # A5[kh, wi, wo, ci, co] = w_t[kh, wi-wo+pad, ci, co] if that tap exists else 0
    A5 = w_t[:, kw_c, :, :] * valid[None, :, :, None, None]
    A = jnp.transpose(A5, (0, 1, 3, 2, 4)).reshape(KH, W_in * Cin, W_out * Cout)
    # Concatenate taps along output columns: A_cat[:, kh*WoC:(kh+1)*WoC] = A[kh]
    A_cat = jnp.transpose(A, (1, 0, 2)).reshape(W_in * Cin, KH * W_out * Cout)
    return A_cat, W_out


def basic_conv_forward(x_nchw, weight, *, padding=1):
    """BasicConv forward (default ctor args): Conv2d(stride=1, pad=padding,
    dilation=1, groups=1, bias=False) + ReLU.

    x_nchw : (N, Cin, H, W) float32
    weight : (Cout, Cin, KH, KW) float32 (PyTorch layout)
    returns: (N, Cout, H_out, W_out) float32
    """
    N, Cin, H, W = x_nchw.shape
    Cout, Cin_w, KH, KW = weight.shape
    assert Cin == Cin_w
    Hp = H + 2 * padding
    H_out = Hp - KH + 1

    A_cat, W_out = _conv_as_row_matmul_weights(weight, W, padding)
    WoC = W_out * Cout  # 16*8 = 128 here -> fully lane-dense output stores

    # Single fused preprocessing pass: NCHW -> per-row (W*Cin) layout, add the
    # 2-row H halo (folded into the same layout-change op), cast to bf16.
    x_rows = jnp.transpose(x_nchw, (0, 2, 3, 1)).reshape(N, H, W * Cin)
    x_rows = jnp.pad(x_rows, ((0, 0), (padding, padding), (0, 0)))
    x_rows = x_rows.astype(jnp.bfloat16)
    a_bf16 = A_cat.astype(jnp.bfloat16)

    kernel = _make_conv_relu_kernel(KH, H_out, WoC)

    out = pl.pallas_call(
        kernel,
        out_shape=jax.ShapeDtypeStruct((N, H_out, WoC), jnp.float32),
        grid_spec=pltpu.PrefetchScalarGridSpec(
            num_scalar_prefetch=0,
            grid=(N,),
            in_specs=[
                pl.BlockSpec((None, Hp, W * Cin), lambda b: (b, 0, 0)),
                pl.BlockSpec((W * Cin, KH * WoC), lambda b: (0, 0)),
            ],
            out_specs=pl.BlockSpec((None, H_out, WoC), lambda b: (b, 0, 0)),
        ),
        compiler_params=pltpu.CompilerParams(
            dimension_semantics=("parallel",),
            vmem_limit_bytes=32 * 1024 * 1024,
        ),
    )(x_rows, a_bf16)

    # Lane-dense (N, H_out, W_out*Cout) -> NCHW in the wrapper.
    out = out.reshape(N, H_out, W_out, Cout)
    return jnp.transpose(out, (0, 3, 1, 2))


def _reference(x_nchw, weight, padding=1):
    out = jax.lax.conv_general_dilated(
        x_nchw, weight,
        window_strides=(1, 1),
        padding=((padding, padding), (padding, padding)),
        dimension_numbers=("NCHW", "OIHW", "NCHW"),
        precision=jax.lax.Precision.HIGHEST,
    )
    return jnp.maximum(out, 0.0)


if __name__ == "__main__":
    # BasicConv(in_planes=4, out_planes=8, kernel_size=3) -> conv + relu
    N, Cin, H, W = 2, 4, 16, 16
    Cout, K = 8, 3

    key = jax.random.PRNGKey(0)
    kx, kw_key = jax.random.split(key)
    x = jax.random.normal(kx, (N, Cin, H, W), dtype=jnp.float32)
    weight = 0.1 * jax.random.normal(kw_key, (Cout, Cin, K, K), dtype=jnp.float32)

    y = basic_conv_forward(x, weight, padding=1)
    y = jax.block_until_ready(y)

    # Reference on the same bf16-quantized operands (kernel runs the MXU in bf16
    # with f32 accumulation), so the comparison isolates the conv lowering.
    xq = x.astype(jnp.bfloat16).astype(jnp.float32)
    wq = weight.astype(jnp.bfloat16).astype(jnp.float32)
    y_ref = _reference(xq, wq, padding=1)

    assert y.shape == (N, Cout, H, W)
    assert jnp.allclose(y, y_ref, atol=1e-2, rtol=1e-2), \
        float(jnp.max(jnp.abs(y - y_ref)))

    # TODO(synk): bn=True / bias=True / up_size>0 (bilinear upsample) / fan=True
    # (ConvTranspose2d) branches of BasicConv are not exercised by the default
    # constructor args and are not implemented here.
    print("KERNEL_OK")
</pallas_src>

<mosaic_0001>
module attributes {stable_mosaic.version = 11 : i64} {
  func.func @kernel(%arg0: i32, %arg1: memref<1x18x64xbf16, #tpu.memory_space<vmem>>, %arg2: memref<64x384xbf16, #tpu.memory_space<vmem>>, %arg3: memref<1x16x128xf32, #tpu.memory_space<vmem>>) attributes {dimension_semantics = [#tpu.dimension_semantics<parallel>], iteration_bounds = array<i64: 2>, scalar_prefetch = 0 : i64, scratch_operands = 0 : i64, tpu.core_type = #tpu.core_type<tc>, window_params = [{transform_indices = @transform_0, window_bounds = array<i64: 1, 18, 64>}, {pipeline_mode = #tpu.pipeline_mode<synchronous>, transform_indices = @transform_1, window_bounds = array<i64: 64, 384>}, {transform_indices = @transform_2, window_bounds = array<i64: 1, 16, 128>}]} {
    %c0 = arith.constant 0 : index
    %c0_0 = arith.constant 0 : index
    %c0_1 = arith.constant 0 : index
    %0 = vector.load %arg1[%c0, %c0_0, %c0_1] : memref<1x18x64xbf16, #tpu.memory_space<vmem>>, vector<1x18x64xbf16>
    %1 = vector.shape_cast %0 : vector<1x18x64xbf16> to vector<18x64xbf16>
    %c0_2 = arith.constant 0 : index
    %c0_3 = arith.constant 0 : index
    %2 = vector.load %arg2[%c0_2, %c0_3] : memref<64x384xbf16, #tpu.memory_space<vmem>>, vector<64x384xbf16>
    %cst = arith.constant dense<0.000000e+00> : vector<18x384xf32>
    %3 = tpu.matmul %1, %2, %cst {dimension_numbers = #tpu.dot_dimension_numbers<[1], [0], [0], [1], [0, 0, 1, 1], [], []>} : vector<18x64xbf16>, vector<64x384xbf16>, vector<18x384xf32> -> vector<18x384xf32>
    %4 = vector.extract_strided_slice %3 {offsets = [0, 0], sizes = [16, 128], strides = [1, 1]} : vector<18x384xf32> to vector<16x128xf32>
    %5 = vector.extract_strided_slice %3 {offsets = [1, 128], sizes = [16, 128], strides = [1, 1]} : vector<18x384xf32> to vector<16x128xf32>
    %6 = arith.addf %4, %5 : vector<16x128xf32>
    %7 = vector.extract_strided_slice %3 {offsets = [2, 256], sizes = [16, 128], strides = [1, 1]} : vector<18x384xf32> to vector<16x128xf32>
    %8 = arith.addf %6, %7 : vector<16x128xf32>
    %cst_4 = arith.constant 0.000000e+00 : f32
    %9 = vector.broadcast %cst_4 : f32 to vector<16x128xf32>
    %10 = arith.maximumf %8, %9 : vector<16x128xf32>
    %c0_5 = arith.constant 0 : index
    %c0_6 = arith.constant 0 : index
    %c0_7 = arith.constant 0 : index
    %11 = vector.load %arg3[%c0_5, %c0_6, %c0_7] : memref<1x16x128xf32, #tpu.memory_space<vmem>>, vector<1x16x128xf32>
    %12 = vector.shape_cast %11 : vector<1x16x128xf32> to vector<16x128xf32>
    %13 = vector.shape_cast %10 : vector<16x128xf32> to vector<1x16x128xf32>
    tpu.vector_store %arg3[%c0_5, %c0_6, %c0_7], %13 {strides = array<i32>} : memref<1x16x128xf32, #tpu.memory_space<vmem>>, vector<1x16x128xf32>,
    return
  }
  func.func @transform_0(%arg0: i32) -> (i32, i32, i32) {
    %c0_i32 = arith.constant 0 : i32
    %c0_i32_0 = arith.constant 0 : i32
    %c0_i32_1 = arith.constant 0 : i32
    return %arg0, %c0_i32, %c0_i32_0 : i32, i32, i32
  }
  func.func @transform_1(%arg0: i32) -> (i32, i32) {
    %c0_i32 = arith.constant 0 : i32
    %c0_i32_0 = arith.constant 0 : i32
    %c0_i32_1 = arith.constant 0 : i32
    return %c0_i32, %c0_i32_0 : i32, i32
  }
  func.func @transform_2(%arg0: i32) -> (i32, i32, i32) {
    %c0_i32 = arith.constant 0 : i32
    %c0_i32_0 = arith.constant 0 : i32
    %c0_i32_1 = arith.constant 0 : i32
    return %arg0, %c0_i32, %c0_i32_0 : i32, i32, i32
  }
}

</mosaic_0001>

<bundles_post_ra>
// kernel: tpu_custom_call.1
= control target key start
LH: loop header
LB: loop body
LE: loop exit
PB: predicated region body
PF: predicated region fallthrough
CT: control target
= control target key end

     0   :  { %7 = vsyncpa [#allocation3], 0  ;;  %s834_s0 = inlined_call_operand.vmem [shape: bf16[2,18,64], index: 0, kind: input, shape index: {}]   ;;  %s835_s1 = inlined_call_operand.hbm [shape: bf16[64,384], index: 1, kind: input, shape index: {}]   ;;  %s836_s2 = inlined_call_operand.hbm [shape: f32[2,16,128], index: 2, kind: output, shape index: {}]  }
   0x1   :  { %8 = vsyncpa [#allocation4], 0 }
   0x2   :  { %10 = vsyncpa [#allocation4 + $0x1], 0  ;;  %s710_s9 = smov 0   ;;  %s712_s10 = smov 0  }
   0x3   :  { %s714_s11 = smov 0   ;;  %s716_s12 = smov 0  }
   0x4 LB: > { %s731_s13 = sadd.s32 4294967295, %s686_s12   ;;  %s472_s14 = sadd.s32 4294967294, %s686_s12   ;;  %s686_s12 = sphi %s716_s12, %s844_s12   ;;  %s682_s11 = sphi %s714_s11, %s843_s11   ;;  %s678_s10 = sphi %s712_s10, %s842_s10   ;;  %s674_s9 = sphi %s710_s9, %s841_s9  }
   0x5   : > { %s735_s15 = sadd.s32 1, %s686_s12   ;;  %s70_s16 = sadd.s32 1, %s682_s11 }
   0x6   : > { %s67_s17 = ssub.s32 %s686_s12, %s735_s15  ;;  %p80_p0 = scmp.ne.s32.totalorder %s682_s11, %s678_s10 }
   0x7   : > { %p68_p1 = scmp.eq.s32.totalorder %s67_s17, 0  ;;  %p81_p2 = scmp.eq.s32.totalorder %s731_s13, 1 }
   0x8   : > { %p86_p3 = scmp.ne.s32.totalorder %s678_s10, %s674_s9  ;;  %p87_p4 = scmp.eq.s32.totalorder %s472_s14, 1 }
   0x9   : > { %s746_s18 = scalar_select %p68_p1, %s682_s11, %s70_s16  }
   0xa   : > { %p748_p5 = por %p81_p2, %p80_p0  ;;  %p752_p6 = por %p87_p4, %p86_p3 }
   0xb   : > { %p473_p7 = scmp.ge.s32.totalorder %s686_s12, 1  ;;  %p94_p8 = scmp.lt.s32.totalorder %s686_s12, 3 }
   0xc   : > { %s838_s20 = scalar_select %p752_p6, 1, 0 }
   0xd   : > { %p537_p9 = scmp.eq.s32.totalorder %s731_s13, 0  ;;  %p759_p10 = pnand %p473_p7, %p94_p8 }
   0xe   : > { %s688_s22 = smov [#allocation2]  }
   0xf   : > { %s106_s23 = sshll.u32 %s688_s22, 4  ;;  %p529_p11 = pneg %p759_p10  ;;  %s107_s23 = int_to_ptr.vmem [resolvable:$true] %s106_s23 }
  0x10   : > { %s607_s24 = scalar_lea.vmem %s107_s23, 1536  ;;  %p615_p3 = scmp.lt.s32.totalorder %s107_s23, %s107_s23 }
  0x11   : > { %p530_p12 = pnand %p537_p9, %p529_p11  ;;  %p608_p0 = scmp.ne.s32.totalorder %s107_s23, %s607_s24 }
  0x12   : > { %p616_p4 = scmp.lt.s32.totalorder %s607_s24, %s607_s24 }
  0x13   : > { %p598_p13 = pneg %p530_p12 }
  0x14   : > { %p617_p6 = por %p616_p4, %p615_p3 }
  0x15   : > { %p610_p1 = pnand %p608_p0, %p598_p13 }
  0x17   : > { %p611_p2 = pneg %p610_p1 }
  0x19   : > { %p618_p7 = pnand %p617_p6, %p611_p2 }
  0x1b   : > { %621 = shalt.err (!%p618_p7)
}
  0x1c   : > { %s689_s25 = smov 192   ;;  %s690_s26 = smov 12  }
  0x1d   : > { %532 = dma.hbm_to_vmem [thread:$0]  (!%p530_p12), %s835_s1, 1536, %s107_s23, [#allocation3], %s689_s25, %s689_s25, %s690_s26  }
  0x1e   : > { %130 = sbr.rel (%p759_p10) target bundleno = 279 (0x117), region = 28 }
  0x23   : > { %665 = dma.done.wait (%p537_p9), [#allocation3], 1536  }
  0x24   : > { %667 = vsyncadd (%p537_p9), [#allocation3], 4294965760  ;;  %v691_v0 = vmov 0   ;;  %p152_p6 = scmp.lt.s32.totalorder %s731_s13, 1  ;;  %v578_v1 = vld [vmem:[#allocation2 + $0x4c] ss:$12 sps:$4 sm:$0xff]  }
  0x25   : > { %288 = vmatprep.mubr.bf16.mxu0 %v691_v0  ;;  %v580_v2 = vld [vmem:[#allocation2 + $0x50] ss:$12 sps:$4 sm:$0xff]   ;;  %264 = vmatprep.subr.bf16.mxu0 %v578_v1  ;;  %v581_v3 = vld [vmem:[#allocation2 + $0x48] ss:$12 sps:$4 sm:$0xff]   ;;  %v584_v5 = vld [vmem:[#allocation2 + $0x38] ss:$12 sps:$4 sm:$0xff]  }
  0x26   : > { %s153_s29 = scalar_select %p152_p6, %s731_s13, 1  ;;  %510 = vmatprep.subr.bf16.mxu1 %v580_v2  ;;  %v582_v4 = vld [vmem:[#allocation2 + $0x34] ss:$12 sps:$4 sm:$0xff]   ;;  %265 = vmatpush1.bf16.msra.mxu0 %v581_v3  ;;  %v585_v6 = vld [vmem:[#allocation2 + $0x30] ss:$12 sps:$4 sm:$0xff]   ;;  %vm249_vm0 = vcmask 523264  }
  0x27   : > { %511 = vmatpush3.bf16.msra.mxu1 %v580_v2  ;;  %266 = vmatprep.subr.bf16.mxu0 %v582_v4  ;;  %v586_v7 = vld [vmem:[#allocation2 + $0x1c] ss:$12 sps:$4 sm:$0xff]   ;;  %v588_v8 = vld [vmem:[#allocation2 + $0x20] ss:$12 sps:$4 sm:$0xff]   ;;  %v589_v9 = vld [vmem:[#allocation2 + $0x18] ss:$12 sps:$4 sm:$0xff]  }
  0x28   : > { %s522_s30 = smul.u32 12, %s153_s29  ;;  %512 = vmatprep.subr.bf16.mxu1 %v584_v5  ;;  %v590_v10 = vld [vmem:[#allocation2 + $0x4] ss:$12 sps:$4 sm:$0xff]   ;;  %v592_v11 = vld [vmem:[#allocation2 + $0x8] ss:$12 sps:$4 sm:$0xff]   ;;  %vm357_vm1 = vcmask 1046528  }
  0x29   : > { %v593_v13 = vld [vmem:[#allocation2] ss:$12 sps:$4 sm:$0xff]   ;;  %s149_s6 = sand.u32 1, %s678_s10   ;;  %vm370_vm2 = vcmask 1045504   ;;  %s503_s16 = sshll.u32 %s731_s13, 8 }
  0x2a   : > { %s156_s5 = scalar_lea.vmem %s834_s0, %s522_s30  ;;  %267 = vmatpush1.bf16.msra.mxu0 %v585_v6  ;;  %s478_s7 = sshll.u32 %s149_s6, 4 }
  0x2b   : > { %513 = vmatpush3.bf16.msra.mxu1 %v584_v5  ;;  %268 = vmatprep.subr.bf16.mxu0 %v586_v7  ;;  %v594_v12 = vld [vmem:[%s156_s5] sm:$0xff]   ;;  %v595_v14 = vld [vmem:[%s156_s5 + $0x8] ss:$0 sps:$4 sm:$0x11]   ;;  %s151_s8 = scalar_lea.vmem [#allocation5], %s478_s7  ;;  %s792_s22 = scalar_lea.hbm %s836_s2, %s503_s16 }
  0x2c   : > { %514 = vmatprep.subr.bf16.mxu1 %v588_v8  ;;  %518 = vmatprep.mubr.msk.bf16.mxu1 %vm249_vm0, %v594_v12  ;;  %s398_s14 = sshll.u32 %s151_s8, 4  ;;  %s794_s23 = scalar_lea.sflag [#allocation4], %s149_s6  ;;  %s787_s14 = int_to_ptr.vmem [resolvable:$true] %s398_s14 }
  0x2d   : > { %s622_s24 = scalar_lea.vmem %s787_s14, 256  ;;  %s692_s13 = smov [#allocation5]  }
  0x2e   : > { %269 = vmatpush1.bf16.msra.mxu0 %v589_v9  ;;  %p623_p8 = scmp.ne.s32.totalorder %s787_s14, %s622_s24  ;;  %s626_s25 = sshll.u32 %s692_s13, 4  ;;  %s627_s25 = int_to_ptr.vmem [resolvable:$false] %s626_s25 }
  0x2f   : > { %515 = vmatpush3.bf16.msra.mxu1 %v588_v8  ;;  %270 = vmatprep.subr.bf16.mxu0 %v590_v10  ;;  %s628_s26 = scalar_lea.vmem %s627_s25, 512  ;;  %p629_p11 = scmp.lt.s32.totalorder %s787_s14, %s627_s25 }
  0x30   : > { %516 = vmatprep.subr.bf16.mxu1 %v592_v11  ;;  %p624_p9 = pnand %p623_p8, %p748_p5  ;;  %p630_p12 = scmp.lt.s32.totalorder %s628_s26, %s622_s24 }
  0x32   : > { %271 = vmatpush1.bf16.msra.mxu0 %v593_v13  ;;  %p625_p10 = pneg %p624_p9  ;;  %p631_p13 = por %p630_p12, %p629_p11 }
  0x33   : > { %517 = vmatpush3.bf16.msra.mxu1 %v592_v11 }
  0x34   : > { %p632_p0 = pnand %p631_p13, %p625_p10 }
  0x35   : > { %494 = vmatmul.mubr.msk.bf16.vlgmr.msra.gmra.mxu0 %vm249_vm0, %v594_v12 }
  0x36   : > { %519 = vmatmul.mubr.msk.bf16.vlgmr.msra.gmra.mxu1 %vm249_vm0, %v595_v14  ;;  %298 = vmatprep.mubr.bf16.mxu0 %v691_v0 }
  0x3d   : > { %495 = vmatmul.mubr.msk.bf16.gmra.mxu0 %vm249_vm0, %v595_v14 }
  0xf5   : > { %v290_v15 = vpop.f32.mrf.mxu0 }
  0xf6   : > { %v520_v16 = vpop.f32.mrf.mxu1 }
  0xf7   : > { %v292_v17 = vpop.f32.mrf.mxu0  ;;  %v374_v31 = vrot.slane %v520_v16, 2 }
  0xf8   : > { %v340_v18 = vpop.f32.mrf.mxu1  ;;  %v358_v23 = vrot.slane %v292_v17, 1 }
  0xf9   : > { %v294_v19 = vpop.f32.mrf.mxu0  ;;  %v371_v24 = vrot.slane %v340_v18, 2 }
  0xfa   : > { %v521_v20 = vpop.f32.mrf.mxu1 }
  0xfb   : > { %v296_v21 = vpop.f32.mrf.mxu0 }
  0xfc   : > { %v343_v22 = vpop.f32.mrf.mxu1  ;;  %v359_v25 = vrot.slane %v296_v21, 1 }
  0xfd   : > { %v372_v26 = vrot.slane %v343_v22, 2  ;;  %v300_v27 = vpop.f32.mrf.mxu0 }
  0xfe   : > { %v360_v28 = vsel %vm357_vm1, %v358_v23, %v359_v25 }
  0xff   : > { %v365_v29 = vadd.f32 %v360_v28, %v290_v15  ;;  %v301_v30 = vpop.f32.mrf.mxu0  ;;  %v373_v32 = vsel %vm370_vm2, %v371_v24, %v372_v26  ;;  %v375_v40 = vsel %vm370_vm2, %v372_v26, %v374_v31 }
 0x100   : > { %v361_v33 = vrot.slane %v301_v30, 1 }
 0x101   : > { %v378_v34 = vadd.f32 %v373_v32, %v365_v29  ;;  %v303_v35 = vpop.f32.mrf.mxu0 }
 0x102   : > { %v362_v36 = vsel %vm357_vm1, %v359_v25, %v361_v33 }
 0x103   : > { %v380_v37 = vmax.f32 %v378_v34, 0.0  ;;  %v366_v38 = vadd.f32 %v362_v36, %v294_v19  ;;  %v304_v39 = vpop.f32.mrf.mxu0 }
 0x105   : > { %382 = vst [vmem:[%s151_s8] sm:$0xff] %v380_v37  ;;  %v379_v41 = vadd.f32 %v375_v40, %v366_v38 }
 0x107   : > { %v381_v42 = vmax.f32 %v379_v41, 0.0 }
 0x109   : > { %383 = vst [vmem:[%s151_s8 + $0x8] sm:$0xff] %v381_v42 }
 0x10a   : > { %635 = shalt.err (!%p632_p0)
}
 0x10b   : > { %s636_s27 = scalar_lea.hbm %s792_s22, 256  ;;  %s640_s30 = scalar_lea.hbm %s836_s2, 512 }
 0x10c   : > { %p637_p1 = scmp.ne.s32.totalorder %s792_s22, %s636_s27  ;;  %p641_p4 = scmp.lt.s32.totalorder %s792_s22, %s836_s2 }
 0x10d   : > { %p642_p7 = scmp.lt.s32.totalorder %s640_s30, %s636_s27 }
 0x10e   : > { %p638_p2 = pnand %p637_p1, %p748_p5 }
 0x10f   : > { %p643_p6 = por %p642_p7, %p641_p4 }
 0x110   : > { %p639_p3 = pneg %p638_p2 }
 0x112   : > { %p644_p8 = pnand %p643_p6, %p639_p3 }
 0x114   : > { %647 = shalt.err (!%p644_p8)
}
 0x115   : > { %s693_s5 = smov 128   ;;  %s694_s6 = smov 8  }
 0x116   : > { %527 = dma.vmem_to_hbm [thread:$0]  (%p748_p5), %s787_s14, 256, %s792_s22, %s794_s23, %s693_s5, %s693_s5, %s694_s6  }
 0x117 PF: > { %p539_p9 = scmp.ge.s32.totalorder %s686_s12, 2  ;;  %s413_s7 = sand.u32 1, %s674_s9  }
 0x118   : > { %p840_p10 = scmp.ne.s32.totalorder %s838_s20, 0  ;;  %s414_s8 = scalar_lea.sflag [#allocation4], %s413_s7 }
 0x11a   : > { %p534_p11 = pnand %p539_p9, %p840_p10 }
 0x11c   : > { %p535_p12 = pneg %p534_p11 }
 0x11e   : > { %669 = dma.done.wait (%p535_p12), %s414_s8, 256  }
 0x11f   : > { %671 = vsyncadd (%p535_p12), %s414_s8, 4294967040  ;;  %p13_p13 = scmp.ge.s32.totalorder %s735_s15, 4   ;;  %s841_s9 = smov %s678_s10 }
 0x120   : > { %s842_s10 = smov %s682_s11  ;;  %s843_s11 = smov %s746_s18 }
 0x121   : > { %s844_s12 = smov %s735_s15  ;;  %15 = sbr.rel (!%p13_p13) target bundleno = 4 (0x4), region = 68 }
 0x126   :  { %419 = vsyncpa [#allocation3], 1 }
 0x127   :  { %421 = vsyncpa [#allocation3 + $0x1], 1 }
 0x128   :  { %422 = vsyncpa [#allocation4], 1 }
 0x129   :  { %424 = vsyncpa [#allocation4 + $0x1], 1 }

</bundles_post_ra>
